<compile_context>
chip_gen: v6e
topology: v6e:2x2x1
jax: 0.10.0
libtpu: 0.0.40
codegen_flags: <defaults>
</compile_context>

<pallas_src>
import jax
import jax.numpy as jnp
from jax.experimental import pallas as pl
from jax.experimental.pallas import tpu as pltpu


def _round_up(v, m):
    return ((v + m - 1) // m) * m


def gate_kernel(x_ref, wd_ref, bd_ref, wu_ref, bu_ref, o_ref):
    # down-projection: (tile_n, Df) @ (Df, Hf) -> f32 accumulator on the MXU
    h = jnp.dot(x_ref[...], wd_ref[...], preferred_element_type=jnp.float32)
    h = jax.nn.sigmoid(h + bd_ref[...])                   # f32 bias + sigmoid (EUP)
    # up-projection: (tile_n, Hf) @ (Hf, Df) -> f32 accumulator
    y = jnp.dot(h.astype(wu_ref.dtype), wu_ref[...],
                preferred_element_type=jnp.float32)
    o_ref[...] = (y + bu_ref[...]).astype(o_ref.dtype)    # f32 bias, cast on store


def gate_forward(x, w_down, b_down, w_up, b_up, *, tile_n=4096):
    """Gate forward: up(sigmoid(down(x))).

    x: [..., D]; w_down: [D, H]; b_down: [H]; w_up: [H, D]; b_up: [D].
    Weights are stored transposed vs. torch.nn.Linear (plain ``x @ W`` layout).
    """
    orig_shape = x.shape
    D = orig_shape[-1]
    H = w_down.shape[1]
    out_dtype = x.dtype

    x2 = x.reshape(-1, D)
    N = x2.shape[0]

    # Fold `fold` tokens per 128-lane row when D divides 128 (lane-dense IO at
    # native HBM bytes).  Otherwise fall back to fold=1 (full-extent last dim,
    # still correct, just not 128-aligned).
    fold = 128 // D if (D < 128 and 128 % D == 0) else 1
    Df, Hf = D * fold, H * fold

    w_down = w_down.astype(jnp.float32)
    w_up = w_up.astype(jnp.float32)
    if fold > 1:
        eye = jnp.eye(fold, dtype=jnp.float32)
        wd_f = jnp.kron(eye, w_down)            # (Df, Hf) block-diagonal
        wu_f = jnp.kron(eye, w_up)              # (Hf, Df) block-diagonal
    else:
        wd_f, wu_f = w_down, w_up
    bd_f = jnp.tile(b_down.reshape(1, H).astype(jnp.float32), (1, fold))
    bu_f = jnp.tile(b_up.reshape(1, D).astype(jnp.float32), (1, fold))

    # Row tiling: clamp tile_n for tiny inputs, pad only the ragged row tail.
    nf_raw = -(-N // fold)                                  # ceil-div
    tn = max(8, min(_round_up(tile_n, 8), _round_up(nf_raw, 8)))
    nf = _round_up(nf_raw, tn)
    pad_rows = nf * fold - N
    if pad_rows:
        x2 = jnp.pad(x2, ((0, pad_rows), (0, 0)))
    xf = x2.reshape(nf, Df)                                 # free reshape

    # Explicit VMEM budget: double-buffered x/out tiles + f32 in-kernel
    # temporaries + (tiny) weights; floor at 32 MiB, cap at 64 MiB (v7x).
    xb = jnp.dtype(xf.dtype).itemsize
    ob = jnp.dtype(out_dtype).itemsize
    need = (2 * tn * Df * (xb + ob)            # pipelined x / out tiles
            + 4 * tn * (Df + Hf) * 4           # compiler-managed f32 temps
            + 8 * (2 * Df * Hf + Df + Hf)      # weights + biases (buffered)
            + (4 << 20))                       # slack
    vmem_limit = min(max(need, 32 << 20), 64 << 20)

    out_f = pl.pallas_call(
        gate_kernel,
        out_shape=jax.ShapeDtypeStruct((nf, Df), out_dtype),
        grid_spec=pltpu.PrefetchScalarGridSpec(
            num_scalar_prefetch=0,
            grid=(nf // tn,),
            in_specs=[
                pl.BlockSpec((tn, Df), lambda i: (i, 0)),   # x tile (streamed)
                pl.BlockSpec((Df, Hf), lambda i: (0, 0)),   # W_down (grid-constant)
                pl.BlockSpec((1, Hf), lambda i: (0, 0)),    # b_down
                pl.BlockSpec((Hf, Df), lambda i: (0, 0)),   # W_up   (grid-constant)
                pl.BlockSpec((1, Df), lambda i: (0, 0)),    # b_up
            ],
            out_specs=pl.BlockSpec((tn, Df), lambda i: (i, 0)),
        ),
        compiler_params=pltpu.CompilerParams(
            dimension_semantics=("parallel",),              # split token grid on v7x
            vmem_limit_bytes=vmem_limit,
        ),
    )(xf, wd_f, bd_f, wu_f, bu_f)

    out2 = out_f.reshape(nf * fold, D)                      # free reshape
    if pad_rows:
        out2 = out2[:N]                                     # drop dummy tokens only
    return out2.reshape(orig_shape)


if __name__ == "__main__":
    # Module config from the spec: Gate(input_dim=32, low_rank=4) -> H = 8.
    input_dim = 32
    low_rank = 4
    hidden = input_dim // low_rank

    batch, seq = 2, 8

    key = jax.random.PRNGKey(0)
    kx, kwd, kbd, kwu, kbu = jax.random.split(key, 5)

    # Deterministic init mimicking nn.Linear's uniform(-1/sqrt(fan_in), ...).
    bound_d = 1.0 / (input_dim ** 0.5)
    bound_u = 1.0 / (hidden ** 0.5)
    w_down = jax.random.uniform(kwd, (input_dim, hidden), jnp.float32,
                                -bound_d, bound_d)
    b_down = jax.random.uniform(kbd, (hidden,), jnp.float32, -bound_d, bound_d)
    w_up = jax.random.uniform(kwu, (hidden, input_dim), jnp.float32,
                              -bound_u, bound_u)
    b_up = jax.random.uniform(kbu, (input_dim,), jnp.float32, -bound_u, bound_u)

    # Input: [batch, seq, input_dim]; wrapper flattens leading dims internally.
    x = jax.random.normal(kx, (batch, seq, input_dim), jnp.float32)

    out = gate_forward(x, w_down, b_down, w_up, b_up)
    out = jax.block_until_ready(out)

    # Pure-f32 reference (module semantics).
    ref = jax.nn.sigmoid(x @ w_down + b_down) @ w_up + b_up

    assert out.shape == x.shape
    assert jnp.allclose(out, ref, atol=5e-3, rtol=5e-3), \
        "mismatch vs f32 reference"

    print("KERNEL_OK")
</pallas_src>

<mosaic_0001>
module attributes {stable_mosaic.version = 11 : i64} {
  func.func @gate_kernel(%arg0: i32, %arg1: memref<8x128xf32, #tpu.memory_space<vmem>>, %arg2: memref<128x32xf32, #tpu.memory_space<vmem>>, %arg3: memref<1x32xf32, #tpu.memory_space<vmem>>, %arg4: memref<32x128xf32, #tpu.memory_space<vmem>>, %arg5: memref<1x128xf32, #tpu.memory_space<vmem>>, %arg6: memref<8x128xf32, #tpu.memory_space<vmem>>) attributes {dimension_semantics = [#tpu.dimension_semantics<parallel>], iteration_bounds = array<i64: 1>, scalar_prefetch = 0 : i64, scratch_operands = 0 : i64, tpu.core_type = #tpu.core_type<tc>, window_params = [{transform_indices = @transform_0, window_bounds = array<i64: 8, 128>}, {pipeline_mode = #tpu.pipeline_mode<synchronous>, transform_indices = @transform_1, window_bounds = array<i64: 128, 32>}, {pipeline_mode = #tpu.pipeline_mode<synchronous>, transform_indices = @transform_2, window_bounds = array<i64: 1, 32>}, {pipeline_mode = #tpu.pipeline_mode<synchronous>, transform_indices = @transform_3, window_bounds = array<i64: 32, 128>}, {pipeline_mode = #tpu.pipeline_mode<synchronous>, transform_indices = @transform_4, window_bounds = array<i64: 1, 128>}, {transform_indices = @transform_5, window_bounds = array<i64: 8, 128>}]} {
    %c0 = arith.constant 0 : index
    %c0_0 = arith.constant 0 : index
    %0 = vector.load %arg1[%c0, %c0_0] : memref<8x128xf32, #tpu.memory_space<vmem>>, vector<8x128xf32>
    %c0_1 = arith.constant 0 : index
    %c0_2 = arith.constant 0 : index
    %1 = vector.load %arg2[%c0_1, %c0_2] : memref<128x32xf32, #tpu.memory_space<vmem>>, vector<128x32xf32>
    %cst = arith.constant dense<0.000000e+00> : vector<8x32xf32>
    %2 = tpu.matmul %0, %1, %cst {dimension_numbers = #tpu.dot_dimension_numbers<[1], [0], [0], [1], [0, 0, 1, 1], [], []>} : vector<8x128xf32>, vector<128x32xf32>, vector<8x32xf32> -> vector<8x32xf32>
    %c0_3 = arith.constant 0 : index
    %c0_4 = arith.constant 0 : index
    %3 = vector.load %arg3[%c0_3, %c0_4] : memref<1x32xf32, #tpu.memory_space<vmem>>, vector<1x32xf32>
    %4 = vector.broadcast %3 : vector<1x32xf32> to vector<8x32xf32>
    %5 = arith.addf %2, %4 : vector<8x32xf32>
    %6 = arith.negf %5 : vector<8x32xf32>
    %7 = math.exp %6 : vector<8x32xf32>
    %cst_5 = arith.constant 1.000000e+00 : f32
    %8 = vector.broadcast %cst_5 : f32 to vector<8x32xf32>
    %9 = arith.addf %8, %7 : vector<8x32xf32>
    %10 = arith.divf %8, %9 : vector<8x32xf32>
    %c0_6 = arith.constant 0 : index
    %c0_7 = arith.constant 0 : index
    %11 = vector.load %arg4[%c0_6, %c0_7] : memref<32x128xf32, #tpu.memory_space<vmem>>, vector<32x128xf32>
    %cst_8 = arith.constant dense<0.000000e+00> : vector<8x128xf32>
    %12 = tpu.matmul %10, %11, %cst_8 {dimension_numbers = #tpu.dot_dimension_numbers<[1], [0], [0], [1], [0, 0, 1, 1], [], []>} : vector<8x32xf32>, vector<32x128xf32>, vector<8x128xf32> -> vector<8x128xf32>
    %c0_9 = arith.constant 0 : index
    %c0_10 = arith.constant 0 : index
    %13 = vector.load %arg5[%c0_9, %c0_10] : memref<1x128xf32, #tpu.memory_space<vmem>>, vector<1x128xf32>
    %14 = vector.broadcast %13 : vector<1x128xf32> to vector<8x128xf32>
    %15 = arith.addf %12, %14 : vector<8x128xf32>
    %c0_11 = arith.constant 0 : index
    %c0_12 = arith.constant 0 : index
    %16 = vector.load %arg6[%c0_11, %c0_12] : memref<8x128xf32, #tpu.memory_space<vmem>>, vector<8x128xf32>
    tpu.vector_store %arg6[%c0_11, %c0_12], %15 {strides = array<i32>} : memref<8x128xf32, #tpu.memory_space<vmem>>, vector<8x128xf32>,
    return
  }
  func.func @transform_0(%arg0: i32) -> (i32, i32) {
    %c0_i32 = arith.constant 0 : i32
    %c0_i32_0 = arith.constant 0 : i32
    return %arg0, %c0_i32 : i32, i32
  }
  func.func @transform_1(%arg0: i32) -> (i32, i32) {
    %c0_i32 = arith.constant 0 : i32
    %c0_i32_0 = arith.constant 0 : i32
    %c0_i32_1 = arith.constant 0 : i32
    return %c0_i32, %c0_i32_0 : i32, i32
  }
  func.func @transform_2(%arg0: i32) -> (i32, i32) {
    %c0_i32 = arith.constant 0 : i32
    %c0_i32_0 = arith.constant 0 : i32
    %c0_i32_1 = arith.constant 0 : i32
    return %c0_i32, %c0_i32_0 : i32, i32
  }
  func.func @transform_3(%arg0: i32) -> (i32, i32) {
    %c0_i32 = arith.constant 0 : i32
    %c0_i32_0 = arith.constant 0 : i32
    %c0_i32_1 = arith.constant 0 : i32
    return %c0_i32, %c0_i32_0 : i32, i32
  }
  func.func @transform_4(%arg0: i32) -> (i32, i32) {
    %c0_i32 = arith.constant 0 : i32
    %c0_i32_0 = arith.constant 0 : i32
    %c0_i32_1 = arith.constant 0 : i32
    return %c0_i32, %c0_i32_0 : i32, i32
  }
  func.func @transform_5(%arg0: i32) -> (i32, i32) {
    %c0_i32 = arith.constant 0 : i32
    %c0_i32_0 = arith.constant 0 : i32
    return %arg0, %c0_i32 : i32, i32
  }
}

</mosaic_0001>

<bundles_post_ra>
// kernel: tpu_custom_call.1
= control target key start
LH: loop header
LB: loop body
LE: loop exit
PB: predicated region body
PF: predicated region fallthrough
CT: control target
= control target key end

     0   :  { %v322_v1 = vmov 0.0   ;;  %vm323_vm0 = vmmov 0   ;;  %s449_s0 = inlined_call_operand.vmem [shape: f32[8,128], index: 0, kind: input, shape index: {}]   ;;  %s450_s1 = inlined_call_operand.vmem [shape: f32[128,32], index: 1, kind: input, shape index: {}]   ;;  %s451_s2 = inlined_call_operand.vmem [shape: f32[1,32], index: 2, kind: input, shape index: {}]   ;;  %s452_s3 = inlined_call_operand.vmem [shape: f32[32,128], index: 3, kind: input, shape index: {}]   ;;  %s453_s4 = inlined_call_operand.vmem [shape: f32[1,128], index: 4, kind: input, shape index: {}]   ;;  %s454_s5 = inlined_call_operand.hbm [shape: f32[8,128], index: 5, kind: output, shape index: {}]  }
   0x1   :  { %v37_v0 = vld [vmem:[%s450_s1 + $0x78] sm:$0xff]  ;;  %247 = vmatprep.subr.mxu0 %v322_v1  ;;  %v36_v2 = vld [vmem:[%s450_s1 + $0x70] sm:$0xff]  ;;  %279 = vmatprep.mubr.msk.f32.mxu0 %vm323_vm0, %v322_v1  ;;  %v35_v3 = vld [vmem:[%s450_s1 + $0x68] sm:$0xff] }
   0x2   :  { %248 = vmatpush3.msra.mxu0 %v37_v0  ;;  %282 = vmatprep.subr.mxu1 %v322_v1  ;;  %v34_v4 = vld [vmem:[%s450_s1 + $0x60] sm:$0xff] }
   0x3   :  { %249 = vmatprep.subr.mxu0 %v322_v1  ;;  %290 = vmatprep.mubr.msk.f32.mxu1 %vm323_vm0, %v322_v1 }
   0x4   :  { %250 = vmatpush3.msra.mxu0 %v36_v2 }
   0x5   :  { %251 = vmatprep.subr.mxu0 %v322_v1 }
   0x6   :  { %252 = vmatpush3.msra.mxu0 %v35_v3 }
   0x7   :  { %10 = vsyncpa [#allocation3], 0  ;;  %253 = vmatprep.subr.mxu0 %v322_v1  ;;  %v33_v5 = vld [vmem:[%s450_s1 + $0x58] sm:$0xff]  ;;  %v32_v6 = vld [vmem:[%s450_s1 + $0x50] sm:$0xff]  ;;  %vm132_vm1 = vcmask 261120   ;;  %s324_s11 = smov [#allocation2]  }
   0x8   :  { %254 = vmatpush3.msra.mxu0 %v34_v4  ;;  %v31_v7 = vld [vmem:[%s450_s1 + $0x48] sm:$0xff]  ;;  %v30_v8 = vld [vmem:[%s450_s1 + $0x40] sm:$0xff]  ;;  %v29_v9 = vld [vmem:[%s450_s1 + $0x38] sm:$0xff]  ;;  %s213_s12 = sshll.u32 %s324_s11, 4  ;;  %s214_s12 = int_to_ptr.vmem [resolvable:$true] %s213_s12 }
   0x9   :  { %255 = vmatprep.subr.mxu0 %v322_v1  ;;  %v28_v10 = vld [vmem:[%s450_s1 + $0x30] sm:$0xff]  ;;  %v27_v11 = vld [vmem:[%s450_s1 + $0x28] sm:$0xff]  ;;  %v26_v12 = vld [vmem:[%s450_s1 + $0x20] sm:$0xff]  ;;  %p305_p1 = scmp.lt.s32.totalorder %s214_s12, %s214_s12 }
   0xa   :  { %256 = vmatpush3.msra.mxu0 %v33_v5  ;;  %v25_v13 = vld [vmem:[%s450_s1 + $0x18] sm:$0xff]  ;;  %v24_v14 = vld [vmem:[%s450_s1 + $0x10] sm:$0xff]  ;;  %v23_v15 = vld [vmem:[%s450_s1 + $0x8] sm:$0xff] }
   0xb   :  { %257 = vmatprep.subr.mxu0 %v322_v1  ;;  %v22_v16 = vld [vmem:[%s450_s1] sm:$0xff]  ;;  %v124_v18 = vld [vmem:[%s452_s3 + $0x18] sm:$0xff]  ;;  %v123_v19 = vld [vmem:[%s452_s3 + $0x10] sm:$0xff] }
   0xc   :  { %258 = vmatpush3.msra.mxu0 %v32_v6  ;;  %v21_v17 = vld [vmem:[%s449_s0] sm:$0xff]  ;;  %283 = vmatpush3.msra.mxu1 %v124_v18  ;;  %v122_v20 = vld [vmem:[%s452_s3 + $0x8] sm:$0xff] }
   0xd   :  { %259 = vmatprep.subr.mxu0 %v322_v1  ;;  %284 = vmatprep.subr.mxu1 %v322_v1  ;;  %v121_v21 = vld [vmem:[%s452_s3] sm:$0xff] }
   0xe   :  { %260 = vmatpush3.msra.mxu0 %v31_v7  ;;  %285 = vmatpush3.msra.mxu1 %v123_v19  ;;  %v221_v22 = vld [vmem:[%s451_s2] ss:$0 sm:$0xff]  ;;  %s300_s2 = scalar_lea.vmem %s214_s12, 128 }
   0xf   :  { %261 = vmatprep.subr.mxu0 %v322_v1  ;;  %286 = vmatprep.subr.mxu1 %v322_v1  ;;  %v223_v30 = vld [vmem:[%s453_s4] ss:$0 sm:$0xff]  ;;  %p301_p0 = scmp.ne.s32.totalorder %s214_s12, %s300_s2  ;;  %p306_p2 = scmp.lt.s32.totalorder %s300_s2, %s300_s2 }
  0x10   :  { %262 = vmatpush3.msra.mxu0 %v30_v8  ;;  %287 = vmatpush3.msra.mxu1 %v122_v20 }
  0x11   :  { %263 = vmatprep.subr.mxu0 %v322_v1  ;;  %288 = vmatprep.subr.mxu1 %v322_v1  ;;  %p307_p3 = por %p306_p2, %p305_p1 }
  0x12   :  { %264 = vmatpush3.msra.mxu0 %v29_v9  ;;  %289 = vmatpush3.msra.mxu1 %v121_v21 }
  0x13   :  { %265 = vmatprep.subr.mxu0 %v322_v1  ;;  %p308_p4 = pnand %p307_p3, %p301_p0 }
  0x14   :  { %266 = vmatpush3.msra.mxu0 %v28_v10 }
  0x15   :  { %267 = vmatprep.subr.mxu0 %v322_v1 }
  0x16   :  { %268 = vmatpush3.msra.mxu0 %v27_v11 }
  0x17   :  { %269 = vmatprep.subr.mxu0 %v322_v1 }
  0x18   :  { %270 = vmatpush3.msra.mxu0 %v26_v12 }
  0x19   :  { %271 = vmatprep.subr.mxu0 %v322_v1 }
  0x1a   :  { %272 = vmatpush3.msra.mxu0 %v25_v13 }
  0x1b   :  { %273 = vmatprep.subr.mxu0 %v322_v1 }
  0x1c   :  { %274 = vmatpush3.msra.mxu0 %v24_v14 }
  0x1d   :  { %275 = vmatprep.subr.mxu0 %v322_v1 }
  0x1e   :  { %276 = vmatpush3.msra.mxu0 %v23_v15 }
  0x1f   :  { %277 = vmatprep.subr.mxu0 %v322_v1 }
  0x20   :  { %278 = vmatpush3.msra.mxu0 %v22_v16 }
  0x21   :  { %280 = vmatmul.mubr.f32.vlgmr.msra.gmra.mxu0 %v21_v17 }
  0xe1   :  { %v111_v23 = vpop.f32.mrf.mxu0 }
  0xe2   :  { %v112_v24 = vadd.f32 %v221_v22, %v111_v23 }
  0xe3   :  { %v281_v25 = vpop.f32.mrf.mxu0 }
  0xe4   :  { %v222_v26 = vmul.f32 -1.442695, %v112_v24 }
  0xe6   :  { %296 = vpow2.f32 %v222_v26 }
  0xf3   :  { %v297_v27 = vpop.eup %296 }
  0xf4   :  { %v118_v28 = vadd.f32 1.0, %v297_v27 }
  0xf6   :  { %298 = vrcp.f32 %v118_v28 }
 0x103   :  { %v299_v29 = vpop.eup %298 }
 0x104   :  { %291 = vmatmul.mubr.msk.f32.vlgmr.msra.gmra.mxu1 %vm132_vm1, %v299_v29 }
 0x1c4   :  { %v202_v31 = vpop.f32.mrf.mxu1 }
 0x1c5   :  { %v203_v32 = vadd.f32 %v223_v30, %v202_v31 }
 0x1c6   :  { %v292_v33 = vpop.f32.mrf.mxu1 }
 0x1c7   :  { %206 = vst [vmem:[#allocation2] sm:$0xff] %v203_v32 }
 0x1c8   :  { %311 = shalt.err (!%p308_p4)
}
 0x1c9   :  { %216 = dma.vmem_to_hbm [thread:$0]  %s214_s12, 128, %s454_s5, [#allocation3]  }
 0x1ca   :  { %320 = dma.done.wait [#allocation3], 128  }
 0x1cb   :  { %321 = vsyncadd [#allocation3], 4294967168 }
 0x1cc   :  { %220 = vsyncpa [#allocation3], 1 }

</bundles_post_ra>
